<compile_context>
chip_gen: v5e
topology: v5e:2x2
jax: 0.10.0
libtpu: 0.0.40
codegen_flags: <defaults>
</compile_context>

<pallas_src>
import functools

import jax
import jax.numpy as jnp
from jax import lax
from jax.experimental import pallas as pl
from jax.experimental.pallas import tpu as pltpu

REG_MAX = 16                 # cfg.reg_max (deterministic, in-script)
BINS = REG_MAX + 1           # 17
MAX_ROW_TILE = 2048          # rows per grid step


def _round_up(v, m):
    return ((v + m - 1) // m) * m


def _integral_kernel(x_ref, o_ref):
    # x_ref: (row_tile, BINS) f32     o_ref: (1, 1, row_tile) f32
    x = x_ref[...]                                        # (R, 17) lane-sparse load
    # Relayout on the XLU so bins sit on sublanes and rows on lanes.
    if hasattr(pltpu, "einshape"):
        xt = pltpu.einshape("rb->br", x)                  # (17, R) lane-dense
    else:
        xt = x.T                                          # (17, R) fallback
    # project = linspace(0, reg_max, reg_max+1) == iota along the bin axis.
    w = lax.broadcasted_iota(jnp.int32, (BINS, 1), 0).astype(jnp.float32)
    mx = jnp.max(xt, axis=0, keepdims=True)               # (1, R)
    e = jnp.exp(xt - mx)                                  # (17, R) lane-dense EUP
    s = jnp.sum(e, axis=0, keepdims=True)                 # (1, R)
    t = jnp.sum(e * w, axis=0, keepdims=True)             # (1, R)
    # softmax(x) . w == sum(e*w) / sum(e).  approx=True would ride the EUP slot
    # but loosens numerics past the 1e-5-level check below, so keep it exact.
    o = t * pl.reciprocal(s, approx=False)                # (1, R)
    o_ref[...] = o.reshape(o_ref.shape).astype(o_ref.dtype)


@functools.partial(jax.jit, static_argnames=("reg_max",))
def integral_forward(x, reg_max=REG_MAX):
    """x: any shape with total size divisible by 4*(reg_max+1). Returns (-1, 4)."""
    bins = reg_max + 1
    x2 = x.reshape(-1, bins).astype(jnp.float32)          # (m, bins), free reshape
    m = x2.shape[0]

    # Rows per grid step: as large as practical; clamp (sublane-aligned) for
    # small inputs so the single block covers the array exactly. No HBM pad.
    row_tile = min(MAX_ROW_TILE, _round_up(m, 8))
    num_tiles = pl.cdiv(m, row_tile)

    out = pl.pallas_call(
        _integral_kernel,
        out_shape=jax.ShapeDtypeStruct((num_tiles, 1, row_tile), jnp.float32),
        grid_spec=pltpu.PrefetchScalarGridSpec(
            num_scalar_prefetch=0,
            grid=(num_tiles,),
            in_specs=[pl.BlockSpec((row_tile, bins), lambda i: (i, 0))],
            out_specs=pl.BlockSpec((1, 1, row_tile), lambda i: (i, 0, 0)),
        ),
        compiler_params=pltpu.CompilerParams(
            dimension_semantics=("parallel",)),
    )(x2)

    # (num_tiles, 1, row_tile) -> flat per-row scalars; drop tail-tile garbage.
    return out.reshape(-1)[:m].reshape(-1, 4)


def integral_reference(x, project, reg_max=REG_MAX):
    bins = reg_max + 1
    x2 = x.reshape(-1, bins).astype(jnp.float32)
    p = jax.nn.softmax(x2, axis=1)
    return (p @ project.astype(jnp.float32)).reshape(-1, 4)


if __name__ == "__main__":
    key = jax.random.PRNGKey(0)
    # small shapes consistent with the module: (batch=2, anchors=8, 4*(reg_max+1)=68)
    x = jax.random.normal(key, (2, 8, 4 * BINS), dtype=jnp.float32)

    out = integral_forward(x)
    out = jax.block_until_ready(out)

    # buffer `project` = linspace(0, reg_max, reg_max+1), deterministic
    project = jnp.linspace(0.0, float(REG_MAX), BINS, dtype=jnp.float32)
    ref = integral_reference(x, project)

    assert out.shape == ref.shape == (2 * 8, 4), (out.shape, ref.shape)
    assert jnp.allclose(out, ref, atol=1e-5, rtol=1e-4), float(
        jnp.max(jnp.abs(out - ref)))

    print("KERNEL_OK")
</pallas_src>

<mosaic_0001>
module attributes {stable_mosaic.version = 11 : i64} {
  func.func @_integral_kernel(%arg0: i32, %arg1: memref<64x17xf32, #tpu.memory_space<vmem>>, %arg2: memref<1x1x64xf32, #tpu.memory_space<vmem>>) attributes {dimension_semantics = [#tpu.dimension_semantics<parallel>], iteration_bounds = array<i64: 1>, scalar_prefetch = 0 : i64, scratch_operands = 0 : i64, tpu.core_type = #tpu.core_type<tc>, window_params = [{transform_indices = @transform_0, window_bounds = array<i64: 64, 17>}, {transform_indices = @transform_1, window_bounds = array<i64: 1, 1, 64>}]} {
    %c0 = arith.constant 0 : index
    %c0_0 = arith.constant 0 : index
    %0 = vector.load %arg1[%c0, %c0_0] : memref<64x17xf32, #tpu.memory_space<vmem>>, vector<64x17xf32>
    %1 = tpu.transpose %0, [1, 0] : vector<64x17xf32> -> vector<17x64xf32>
    %2 = tpu.iota {dimensions = array<i32: 0>} : vector<17x1xi32>
    %3 = arith.sitofp %2 : vector<17x1xi32> to vector<17x1xf32>
    %cst = arith.constant dense<0xFF800000> : vector<64xf32>
    %4 = vector.multi_reduction <maximumf>, %1, %cst [0] : vector<17x64xf32> to vector<64xf32>
    %5 = vector.shape_cast %4 : vector<64xf32> to vector<1x64xf32>
    %6 = vector.broadcast %5 : vector<1x64xf32> to vector<17x64xf32>
    %7 = arith.subf %1, %6 : vector<17x64xf32>
    %8 = math.exp %7 : vector<17x64xf32>
    %cst_1 = arith.constant dense<0.000000e+00> : vector<64xf32>
    %9 = vector.multi_reduction <add>, %8, %cst_1 [0] : vector<17x64xf32> to vector<64xf32>
    %10 = vector.shape_cast %9 : vector<64xf32> to vector<1x64xf32>
    %11 = vector.broadcast %3 : vector<17x1xf32> to vector<17x64xf32>
    %12 = arith.mulf %8, %11 : vector<17x64xf32>
    %cst_2 = arith.constant dense<0.000000e+00> : vector<64xf32>
    %13 = vector.multi_reduction <add>, %12, %cst_2 [0] : vector<17x64xf32> to vector<64xf32>
    %14 = vector.shape_cast %13 : vector<64xf32> to vector<1x64xf32>
    %15 = tpu.reciprocal %10 : vector<1x64xf32> -> vector<1x64xf32>
    %16 = arith.mulf %14, %15 : vector<1x64xf32>
    %17 = vector.shape_cast %16 : vector<1x64xf32> to vector<1x1x64xf32>
    %c0_3 = arith.constant 0 : index
    %c0_4 = arith.constant 0 : index
    %c0_5 = arith.constant 0 : index
    %18 = vector.load %arg2[%c0_3, %c0_4, %c0_5] : memref<1x1x64xf32, #tpu.memory_space<vmem>>, vector<1x1x64xf32>
    tpu.vector_store %arg2[%c0_3, %c0_4, %c0_5], %17 {strides = array<i32>} : memref<1x1x64xf32, #tpu.memory_space<vmem>>, vector<1x1x64xf32>,
    return
  }
  func.func @transform_0(%arg0: i32) -> (i32, i32) {
    %c0_i32 = arith.constant 0 : i32
    %c0_i32_0 = arith.constant 0 : i32
    return %arg0, %c0_i32 : i32, i32
  }
  func.func @transform_1(%arg0: i32) -> (i32, i32, i32) {
    %c0_i32 = arith.constant 0 : i32
    %c0_i32_0 = arith.constant 0 : i32
    %c0_i32_1 = arith.constant 0 : i32
    return %arg0, %c0_i32, %c0_i32_0 : i32, i32, i32
  }
}

</mosaic_0001>

<bundles_post_ra>
// kernel: integral_forward.1
= control target key start
LH: loop header
LB: loop body
LE: loop exit
PB: predicated region body
PF: predicated region fallthrough
CT: control target
= control target key end

     0   :  { %vm55_vm0 = vcmask 523264   ;;  %vm58_vm1 = vcmask 516096   ;;  %v48_v20 = vlaneseq  ;;  %s178_s0 = inlined_call_operand.vmem [shape: f32[64,17], index: 0, kind: input, shape index: {}]   ;;  %s179_s1 = inlined_call_operand.vmem [shape: f32[1,1,64], index: 1, kind: output, shape index: {}]  }
   0x1   :  { %v8_v0 = vld [vmem:[%s178_s0] sm:$0xff]  ;;  %v9_v1 = vld [vmem:[%s178_s0 + $0x8] sm:$0xff]  ;;  %v10_v2 = vld [vmem:[%s178_s0 + $0x10] sm:$0xff] }
   0x2   :  { %16 = vxpose.xlu0.b32.start [1/8] (short) (narrow) %v8_v0, 24  ;;  %v11_v3 = vld [vmem:[%s178_s0 + $0x18] sm:$0xff]  ;;  %v12_v4 = vld [vmem:[%s178_s0 + $0x20] sm:$0xff]  ;;  %v13_v5 = vld [vmem:[%s178_s0 + $0x28] sm:$0xff]  ;;  %v49_v23 = vshrl.u32 %v48_v20, 7 }
   0x3   :  { %v14_v6 = vld [vmem:[%s178_s0 + $0x30] sm:$0xff]  ;;  %v15_v7 = vld [vmem:[%s178_s0 + $0x38] sm:$0xff] }
   0x4   :  { %v50_v30 = vadd.s32 8, %v49_v23  ;;  %v51_v31 = vadd.s32 16, %v49_v23  ;;  %v52_v32 = vcvt.s32.f32 %v49_v23 }
   0x6   :  { %v53_v33 = vcvt.s32.f32 %v50_v30  ;;  %v54_v36 = vcvt.s32.f32 %v51_v31 }
   0xa   :  { %17 = vxpose.xlu0.b32.cont [2/8] (short) (narrow) %v9_v1, 24 }
  0x12   :  { %18 = vxpose.xlu0.b32.cont [3/8] (short) (narrow) %v10_v2, 24 }
  0x1a   :  { %19 = vxpose.xlu0.b32.cont [4/8] (short) (narrow) %v11_v3, 24 }
  0x22   :  { %20 = vxpose.xlu0.b32.cont [5/8] (short) (narrow) %v12_v4, 24 }
  0x2a   :  { %21 = vxpose.xlu0.b32.cont [6/8] (short) (narrow) %v13_v5, 24 }
  0x32   :  { %22 = vxpose.xlu0.b32.cont [7/8] (short) (narrow) %v14_v6, 24 }
  0x3a   :  { %23 = vxpose.xlu0.b32.end [8/8] (short) (narrow) %v15_v7, 24 }
  0xa6   :  { %v32_v8 = vpop.trf.xlu0 }
  0xa7   :  { %v56_v11 = vsel %vm55_vm0, %v32_v8, -inf }
  0xae   :  { %v33_v9 = vpop.trf.xlu0 }
  0xaf   :  { %v57_v10 = vsel %vm55_vm0, %v33_v9, -inf }
  0xb0   :  { %v60_v12 = vmax.f32 %v56_v11, %v57_v10 }
  0xb6   :  { %v34_v13 = vpop.trf.xlu0 }
  0xb7   :  { %v59_v14 = vsel %vm58_vm1, %v34_v13, -inf }
  0xb8   :  { %v61_v15 = vmax.f32 %v60_v12, %v59_v14 }
  0xba   :  { %v62_v16 = vrot.slane %v61_v15, 4 }
  0xbc   :  { %v63_v17 = vmax.f32 %v61_v15, %v62_v16 }
  0xbe   :  { %v64_v18 = vrot.slane %v63_v17, 2 }
  0xc0   :  { %v65_v19 = vmax.f32 %v63_v17, %v64_v18 }
  0xc2   :  { %v66_v21 = vrot.slane %v65_v19, 1 }
  0xc4   :  { %v67_v22 = vmax.f32 %v65_v19, %v66_v21 }
  0xc6   :  { %v68_v24 = vsub.f32 %v32_v8, %v67_v22  ;;  %v69_v25 = vsub.f32 %v33_v9, %v67_v22  ;;  %v70_v26 = vsub.f32 %v34_v13, %v67_v22 }
  0xc8   :  { %v71_v27 = vmul.f32 1.442695, %v68_v24  ;;  %v73_v28 = vmul.f32 1.442695, %v69_v25  ;;  %v75_v29 = vmul.f32 1.442695, %v70_v26 }
  0xca   :  { %123 = vpow2.f32 %v71_v27 }
  0xcb   :  { %125 = vpow2.f32 %v73_v28 }
  0xcc   :  { %127 = vpow2.f32 %v75_v29 }
  0xd0   :  { %v124_v34 = vpop.eup %123 }
  0xd1   :  { %v126_v35 = vpop.eup %125  ;;  %v77_v37 = vsel %vm55_vm0, %v124_v34, 0.0  ;;  %v88_v38 = vmul.f32 %v124_v34, %v52_v32 }
  0xd2   :  { %v128_v39 = vpop.eup %127  ;;  %v78_v40 = vsel %vm55_vm0, %v126_v35, 0.0  ;;  %v89_v41 = vmul.f32 %v126_v35, %v53_v33 }
  0xd3   :  { %v79_v42 = vadd.f32 %v78_v40, %v77_v37  ;;  %v91_v43 = vsel %vm55_vm0, %v88_v38, 0.0  ;;  %v80_v44 = vsel %vm58_vm1, %v128_v39, 0.0  ;;  %v90_v47 = vmul.f32 %v128_v39, %v54_v36 }
  0xd4   :  { %v92_v45 = vsel %vm55_vm0, %v89_v41, 0.0 }
  0xd5   :  { %v81_v46 = vadd.f32 %v80_v44, %v79_v42  ;;  %v93_v48 = vadd.f32 %v92_v45, %v91_v43  ;;  %v94_v51 = vsel %vm58_vm1, %v90_v47, 0.0 }
  0xd7   :  { %v82_v49 = vrot.slane %v81_v46, 4  ;;  %v95_v52 = vadd.f32 %v94_v51, %v93_v48 }
  0xd9   :  { %v83_v50 = vadd.f32 %v82_v49, %v81_v46  ;;  %v96_v55 = vrot.slane %v95_v52, 4 }
  0xdb   :  { %v84_v53 = vrot.slane %v83_v50, 2  ;;  %v97_v58 = vadd.f32 %v96_v55, %v95_v52 }
  0xdd   :  { %v85_v54 = vadd.f32 %v84_v53, %v83_v50  ;;  %v98_v59 = vrot.slane %v97_v58, 2 }
  0xdf   :  { %v86_v56 = vrot.slane %v85_v54, 1  ;;  %v99_v61 = vadd.f32 %v98_v59, %v97_v58 }
  0xe1   :  { %v87_v57 = vadd.f32 %v86_v56, %v85_v54  ;;  %v100_v1 = vrot.slane %v99_v61, 1 }
  0xe3   :  { %129 = vrcp.f32 %v87_v57  ;;  %v113_v0 = vand.u32 2147483648, %v87_v57  ;;  %v111_v3 = vand.u32 2147483647, %v87_v57  ;;  %vm107_vm3 = vweird.f32 %v87_v57 }
  0xe4   :  { %v101_v6 = vadd.f32 %v100_v1, %v99_v61 }
  0xe5   :  { %v114_v5 = vor.u32 1.1754944e-38, %v113_v0  ;;  %vm112_vm5 = vcmp.eq.f32.partialorder %v111_v3, 8.507059e+37 }
  0xe9   :  { %v130_v60 = vpop.eup %129 }
  0xea   :  { %v103_v62 = vmul.f32 %v130_v60, %v87_v57  ;;  %vm108_vm2 = vweird.f32 %v130_v60 }
  0xeb   :  { %vm109_vm4 = vmor %vm107_vm3, %vm108_vm2 }
  0xec   :  { %v104_v63 = vsub.f32 1.0, %v103_v62 }
  0xee   :  { %v105_v2 = vmul.f32 %v130_v60, %v104_v63 }
  0xf0   :  { %v106_v4 = vadd.f32 %v130_v60, %v105_v2 }
  0xf2   :  { %v110_v7 = vsel %vm109_vm4, %v130_v60, %v106_v4 }
  0xf3   :  { %v115_v8 = vsel %vm112_vm5, %v114_v5, %v110_v7 }
  0xf4   :  { %v116_v9 = vmul.f32 %v115_v8, %v101_v6 }
  0xf6   :  { %117 = vst.msk [vmem:[%s179_s1] sm:$0x1] %vm58_vm1, %v116_v9 }

</bundles_post_ra>
